<compile_context>
chip_gen: v7x
topology: tpu7x:2x2x1
jax: 0.10.0
libtpu: 0.0.40
codegen_flags: <defaults>
</compile_context>

<pallas_src>
import functools

import jax
import jax.numpy as jnp
import numpy as np
from jax.experimental import pallas as pl
from jax.experimental.pallas import tpu as pltpu


_HALF_LOG_2PI = 0.9189385332046727


# ---------------------------------------------------------------------------
# In-kernel special functions (f32, VPU/EUP friendly).
# ---------------------------------------------------------------------------
def _digamma(x):
    """digamma(x) for x > 0: 6-step shift (paired reciprocals) + asymptotic series."""
    acc = jnp.zeros_like(x)
    z = x
    for _ in range(3):                       # two shifts per iteration
        z1 = z + 1.0
        acc = acc + (z + z1) / (z * z1)      # 1/z + 1/(z+1) with a single divide
        z = z + 2.0
    inv = 1.0 / z
    inv2 = inv * inv
    return (jnp.log(z) - 0.5 * inv
            - inv2 * ((1.0 / 12.0) - inv2 * ((1.0 / 120.0) - inv2 * (1.0 / 252.0)))
            - acc)


def _digamma_lgamma(x):
    """Fused digamma(x) & lgamma(x) for x > 0, sharing the shift ladder, reciprocals
    and logs (one log of the running product replaces 6 separate logs; safe for
    alpha < ~2.7e6 in f32)."""
    acc = jnp.zeros_like(x)
    prod = jnp.ones_like(x)
    z = x
    for _ in range(3):
        z1 = z + 1.0
        pair = z * z1
        acc = acc + (z + z1) / pair
        prod = prod * pair
        z = z + 2.0
    inv = 1.0 / z
    inv2 = inv * inv
    logz = jnp.log(z)
    dg = (logz - 0.5 * inv
          - inv2 * ((1.0 / 12.0) - inv2 * ((1.0 / 120.0) - inv2 * (1.0 / 252.0)))
          - acc)
    lg = ((z - 0.5) * logz - z + _HALF_LOG_2PI
          + inv * ((1.0 / 12.0) - inv2 * ((1.0 / 360.0) - inv2 * (1.0 / 1260.0)))
          - jnp.log(prod))
    return dg, lg


# ---------------------------------------------------------------------------
# Kernel: per-row Bayesian loss over one lane-dense batch tile.
# ---------------------------------------------------------------------------
def _bayesian_loss_kernel(alpha_ref, y_ref, out_ref, *, entropy_weight, num_classes,
                          batch):
    # alpha_ref: [C, TB]  (classes on sublanes, batch on the 128-lane axis)
    # y_ref:     [1, TB]  int32 labels
    # out_ref:   [1, TB]  per-row loss (lane-dense output slab)
    alpha = alpha_ref[...].astype(jnp.float32)
    y = y_ref[...]
    C, TB = alpha.shape

    class_ids = jax.lax.broadcasted_iota(jnp.int32, (C, TB), 0)
    onehot = (class_ids == y).astype(jnp.float32)              # [C, TB]
    alpha0 = jnp.sum(alpha, axis=0, keepdims=True)             # [1, TB]

    if entropy_weight == 0.0:
        # Fast path: only 2 digammas per row instead of (C+1) digammas + lgammas.
        alpha_y = jnp.sum(onehot * alpha, axis=0, keepdims=True)
        loss = _digamma(alpha0) - _digamma(alpha_y)            # = -ELL
    else:
        w = float(entropy_weight)
        dg_a, lg_a = _digamma_lgamma(alpha)                    # [C, TB]
        dg_0, lg_0 = _digamma_lgamma(alpha0)                   # [1, TB]
        # Single fused class-axis reduction:
        #   loss = sum_j[-onehot_j*dg_j - w*(lg_j - (a_j-1)*dg_j)]
        #          + dg_0 + w*lg_0 - w*(a_0 - C)*dg_0
        per_class = -onehot * dg_a - w * (lg_a - (alpha - 1.0) * dg_a)
        loss = (jnp.sum(per_class, axis=0, keepdims=True)
                + dg_0 + w * lg_0
                - w * (alpha0 - float(num_classes)) * dg_0)

    # Zero out padded batch columns so the wrapper-side sum/mean stay exact.
    col = pl.program_id(0) * TB + jax.lax.broadcasted_iota(jnp.int32, (1, TB), 1)
    out_ref[...] = jnp.where(col < batch, loss, 0.0).astype(jnp.float32)


# ---------------------------------------------------------------------------
# Wrapper
# ---------------------------------------------------------------------------
def bayesian_loss(alpha, y_true, *, entropy_weight=0.0, reduction="mean",
                  block_b=None):
    """alpha: [B, C] Dirichlet concentrations (>0, any float dtype); y_true: [B] int."""
    B, C = alpha.shape

    # Batch-tile size: lane-aligned, sized so ~8 live [C, TB] f32 intermediates
    # stay a few MiB (generation-safe for v5e/v6e/v7x scoped VMEM).
    if block_b is None:
        tb = (6 * 1024 * 1024) // (32 * max(C, 1))
        tb = max(128, min(4096, (tb // 128) * 128))
    else:
        tb = max(128, (int(block_b) // 128) * 128)
    b_aligned = ((B + 127) // 128) * 128
    tb = min(tb, b_aligned)
    b_pad = ((b_aligned + tb - 1) // tb) * tb
    grid_n = b_pad // tb

    # Lane-dense layout: classes on sublanes, batch on lanes. Native dtype kept
    # (cast happens in-kernel); padding alpha with 1.0 keeps digamma/lgamma finite.
    alpha_t = jnp.transpose(alpha)                                    # [C, B]
    alpha_t = jnp.pad(alpha_t, ((0, 0), (0, b_pad - B)), constant_values=1.0)
    y2d = jnp.pad(y_true.astype(jnp.int32).reshape(1, B),
                  ((0, 0), (0, b_pad - B)), constant_values=0)

    kernel = functools.partial(
        _bayesian_loss_kernel,
        entropy_weight=float(entropy_weight),
        num_classes=C,
        batch=B,
    )

    out = pl.pallas_call(
        kernel,
        out_shape=jax.ShapeDtypeStruct((1, b_pad), jnp.float32),
        grid=(grid_n,),
        in_specs=[
            pl.BlockSpec((C, tb), lambda i: (0, i)),
            pl.BlockSpec((1, tb), lambda i: (0, i)),
        ],
        out_specs=pl.BlockSpec((1, tb), lambda i: (0, i)),
        compiler_params=pltpu.CompilerParams(
            dimension_semantics=("parallel",),
            vmem_limit_bytes=32 * 1024 * 1024,
        ),
    )(alpha_t, y2d)

    per_row = out[0, :B]
    if reduction == "mean":
        return jnp.sum(per_row) / B
    if reduction == "sum":
        return jnp.sum(per_row)
    return per_row


# ---------------------------------------------------------------------------
# Pure-JAX reference (correctness check only)
# ---------------------------------------------------------------------------
def _reference_loss(alpha, y_true, entropy_weight, reduction):
    from jax.scipy.special import digamma, gammaln
    B, C = alpha.shape
    a0 = jnp.sum(alpha, axis=-1)
    a_y = jnp.take_along_axis(alpha, y_true[:, None], axis=-1)[:, 0]
    ell = digamma(a_y) - digamma(a0)
    log_beta = jnp.sum(gammaln(alpha), axis=-1) - gammaln(a0)
    entropy = (log_beta + (a0 - C) * digamma(a0)
               - jnp.sum((alpha - 1.0) * digamma(alpha), axis=-1))
    loss = -ell - entropy_weight * entropy
    if reduction == "mean":
        return loss.mean()
    if reduction == "sum":
        return loss.sum()
    return loss


if __name__ == "__main__":
    key = jax.random.PRNGKey(0)
    k1, k2, k3, k4 = jax.random.split(key, 4)

    # Case 1: small batch, entropy regularizer on, all reductions.
    B, C = 8, 16
    alpha = jax.nn.softplus(jax.random.normal(k1, (B, C), jnp.float32)) + 1.0
    y_true = jax.random.randint(k2, (B,), 0, C)
    w = 0.05

    for red in ("mean", "sum", "none"):
        out = bayesian_loss(alpha, y_true, entropy_weight=w, reduction=red)
        jax.block_until_ready(out)
        ref = _reference_loss(alpha, y_true, w, red)
        np.testing.assert_allclose(np.asarray(out), np.asarray(ref),
                                   rtol=1e-3, atol=1e-3)

    # Case 2: module default entropy_weight == 0.0 (specialized digamma-only path).
    out0 = bayesian_loss(alpha, y_true, entropy_weight=0.0, reduction="mean")
    jax.block_until_ready(out0)
    ref0 = _reference_loss(alpha, y_true, 0.0, "mean")
    np.testing.assert_allclose(np.asarray(out0), np.asarray(ref0),
                               rtol=1e-3, atol=1e-3)

    # Case 3: multi-tile grid with padded/masked batch tail.
    B2 = 300
    alpha2 = jax.nn.softplus(jax.random.normal(k3, (B2, C), jnp.float32)) + 0.5
    y2 = jax.random.randint(k4, (B2,), 0, C)
    out2 = bayesian_loss(alpha2, y2, entropy_weight=w, reduction="mean", block_b=128)
    jax.block_until_ready(out2)
    ref2 = _reference_loss(alpha2, y2, w, "mean")
    np.testing.assert_allclose(np.asarray(out2), np.asarray(ref2),
                               rtol=1e-3, atol=1e-3)

    print("KERNEL_OK")
</pallas_src>

<mosaic_0001>
module attributes {stable_mosaic.version = 11 : i64} {
  func.func @_bayesian_loss_kernel(%arg0: i32, %arg1: memref<16x128xf32, #tpu.memory_space<vmem>>, %arg2: memref<1x128xi32, #tpu.memory_space<vmem>>, %arg3: memref<1x128xf32, #tpu.memory_space<vmem>>) attributes {dimension_semantics = [#tpu.dimension_semantics<parallel>], iteration_bounds = array<i64: 1>, scalar_prefetch = 0 : i64, scratch_operands = 0 : i64, tpu.core_type = #tpu.core_type<tc>, window_params = [{transform_indices = @transform_0, window_bounds = array<i64: 16, 128>}, {transform_indices = @transform_1, window_bounds = array<i64: 1, 128>}, {transform_indices = @transform_2, window_bounds = array<i64: 1, 128>}]} {
    %c0 = arith.constant 0 : index
    %c0_0 = arith.constant 0 : index
    %0 = vector.load %arg1[%c0, %c0_0] : memref<16x128xf32, #tpu.memory_space<vmem>>, vector<16x128xf32>
    %c0_1 = arith.constant 0 : index
    %c0_2 = arith.constant 0 : index
    %1 = vector.load %arg2[%c0_1, %c0_2] : memref<1x128xi32, #tpu.memory_space<vmem>>, vector<1x128xi32>
    %2 = tpu.iota {dimensions = array<i32: 0>} : vector<16x128xi32>
    %3 = vector.broadcast %1 : vector<1x128xi32> to vector<16x128xi32>
    %4 = arith.cmpi eq, %2, %3 : vector<16x128xi32>
    %5 = arith.extui %4 : vector<16x128xi1> to vector<16x128xi32>
    %6 = arith.sitofp %5 : vector<16x128xi32> to vector<16x128xf32>
    %cst = arith.constant dense<0.000000e+00> : vector<128xf32>
    %7 = vector.multi_reduction <add>, %0, %cst [0] : vector<16x128xf32> to vector<128xf32>
    %8 = vector.shape_cast %7 : vector<128xf32> to vector<1x128xf32>
    %cst_3 = arith.constant 0.000000e+00 : f32
    %9 = vector.broadcast %cst_3 : f32 to vector<16x128xf32>
    %cst_4 = arith.constant 1.000000e+00 : f32
    %10 = vector.broadcast %cst_4 : f32 to vector<16x128xf32>
    %cst_5 = arith.constant 1.000000e+00 : f32
    %11 = vector.broadcast %cst_5 : f32 to vector<16x128xf32>
    %12 = arith.addf %0, %11 : vector<16x128xf32>
    %13 = arith.mulf %0, %12 : vector<16x128xf32>
    %14 = arith.addf %0, %12 : vector<16x128xf32>
    %15 = arith.divf %14, %13 : vector<16x128xf32>
    %16 = arith.addf %9, %15 : vector<16x128xf32>
    %17 = arith.mulf %10, %13 : vector<16x128xf32>
    %cst_6 = arith.constant 2.000000e+00 : f32
    %18 = vector.broadcast %cst_6 : f32 to vector<16x128xf32>
    %19 = arith.addf %0, %18 : vector<16x128xf32>
    %cst_7 = arith.constant 1.000000e+00 : f32
    %20 = vector.broadcast %cst_7 : f32 to vector<16x128xf32>
    %21 = arith.addf %19, %20 : vector<16x128xf32>
    %22 = arith.mulf %19, %21 : vector<16x128xf32>
    %23 = arith.addf %19, %21 : vector<16x128xf32>
    %24 = arith.divf %23, %22 : vector<16x128xf32>
    %25 = arith.addf %16, %24 : vector<16x128xf32>
    %26 = arith.mulf %17, %22 : vector<16x128xf32>
    %cst_8 = arith.constant 2.000000e+00 : f32
    %27 = vector.broadcast %cst_8 : f32 to vector<16x128xf32>
    %28 = arith.addf %19, %27 : vector<16x128xf32>
    %cst_9 = arith.constant 1.000000e+00 : f32
    %29 = vector.broadcast %cst_9 : f32 to vector<16x128xf32>
    %30 = arith.addf %28, %29 : vector<16x128xf32>
    %31 = arith.mulf %28, %30 : vector<16x128xf32>
    %32 = arith.addf %28, %30 : vector<16x128xf32>
    %33 = arith.divf %32, %31 : vector<16x128xf32>
    %34 = arith.addf %25, %33 : vector<16x128xf32>
    %35 = arith.mulf %26, %31 : vector<16x128xf32>
    %cst_10 = arith.constant 2.000000e+00 : f32
    %36 = vector.broadcast %cst_10 : f32 to vector<16x128xf32>
    %37 = arith.addf %28, %36 : vector<16x128xf32>
    %cst_11 = arith.constant 1.000000e+00 : f32
    %38 = vector.broadcast %cst_11 : f32 to vector<16x128xf32>
    %39 = arith.divf %38, %37 : vector<16x128xf32>
    %40 = arith.mulf %39, %39 : vector<16x128xf32>
    %41 = math.log %37 : vector<16x128xf32>
    %cst_12 = arith.constant 5.000000e-01 : f32
    %42 = vector.broadcast %cst_12 : f32 to vector<16x128xf32>
    %43 = arith.mulf %42, %39 : vector<16x128xf32>
    %44 = arith.subf %41, %43 : vector<16x128xf32>
    %cst_13 = arith.constant 0.0039682542 : f32
    %45 = vector.broadcast %cst_13 : f32 to vector<16x128xf32>
    %46 = arith.mulf %40, %45 : vector<16x128xf32>
    %cst_14 = arith.constant 0.00833333377 : f32
    %47 = vector.broadcast %cst_14 : f32 to vector<16x128xf32>
    %48 = arith.subf %47, %46 : vector<16x128xf32>
    %49 = arith.mulf %40, %48 : vector<16x128xf32>
    %cst_15 = arith.constant 0.0833333358 : f32
    %50 = vector.broadcast %cst_15 : f32 to vector<16x128xf32>
    %51 = arith.subf %50, %49 : vector<16x128xf32>
    %52 = arith.mulf %40, %51 : vector<16x128xf32>
    %53 = arith.subf %44, %52 : vector<16x128xf32>
    %54 = arith.subf %53, %34 : vector<16x128xf32>
    %cst_16 = arith.constant 5.000000e-01 : f32
    %55 = vector.broadcast %cst_16 : f32 to vector<16x128xf32>
    %56 = arith.subf %37, %55 : vector<16x128xf32>
    %57 = arith.mulf %56, %41 : vector<16x128xf32>
    %58 = arith.subf %57, %37 : vector<16x128xf32>
    %cst_17 = arith.constant 0.918938517 : f32
    %59 = vector.broadcast %cst_17 : f32 to vector<16x128xf32>
    %60 = arith.addf %58, %59 : vector<16x128xf32>
    %cst_18 = arith.constant 7.93650805E-4 : f32
    %61 = vector.broadcast %cst_18 : f32 to vector<16x128xf32>
    %62 = arith.mulf %40, %61 : vector<16x128xf32>
    %cst_19 = arith.constant 0.00277777785 : f32
    %63 = vector.broadcast %cst_19 : f32 to vector<16x128xf32>
    %64 = arith.subf %63, %62 : vector<16x128xf32>
    %65 = arith.mulf %40, %64 : vector<16x128xf32>
    %cst_20 = arith.constant 0.0833333358 : f32
    %66 = vector.broadcast %cst_20 : f32 to vector<16x128xf32>
    %67 = arith.subf %66, %65 : vector<16x128xf32>
    %68 = arith.mulf %39, %67 : vector<16x128xf32>
    %69 = arith.addf %60, %68 : vector<16x128xf32>
    %70 = math.log %35 : vector<16x128xf32>
    %71 = arith.subf %69, %70 : vector<16x128xf32>
    %cst_21 = arith.constant 0.000000e+00 : f32
    %72 = vector.broadcast %cst_21 : f32 to vector<1x128xf32>
    %cst_22 = arith.constant 1.000000e+00 : f32
    %73 = vector.broadcast %cst_22 : f32 to vector<1x128xf32>
    %cst_23 = arith.constant 1.000000e+00 : f32
    %74 = vector.broadcast %cst_23 : f32 to vector<1x128xf32>
    %75 = arith.addf %8, %74 : vector<1x128xf32>
    %76 = arith.mulf %8, %75 : vector<1x128xf32>
    %77 = arith.addf %8, %75 : vector<1x128xf32>
    %78 = arith.divf %77, %76 : vector<1x128xf32>
    %79 = arith.addf %72, %78 : vector<1x128xf32>
    %80 = arith.mulf %73, %76 : vector<1x128xf32>
    %cst_24 = arith.constant 2.000000e+00 : f32
    %81 = vector.broadcast %cst_24 : f32 to vector<1x128xf32>
    %82 = arith.addf %8, %81 : vector<1x128xf32>
    %cst_25 = arith.constant 1.000000e+00 : f32
    %83 = vector.broadcast %cst_25 : f32 to vector<1x128xf32>
    %84 = arith.addf %82, %83 : vector<1x128xf32>
    %85 = arith.mulf %82, %84 : vector<1x128xf32>
    %86 = arith.addf %82, %84 : vector<1x128xf32>
    %87 = arith.divf %86, %85 : vector<1x128xf32>
    %88 = arith.addf %79, %87 : vector<1x128xf32>
    %89 = arith.mulf %80, %85 : vector<1x128xf32>
    %cst_26 = arith.constant 2.000000e+00 : f32
    %90 = vector.broadcast %cst_26 : f32 to vector<1x128xf32>
    %91 = arith.addf %82, %90 : vector<1x128xf32>
    %cst_27 = arith.constant 1.000000e+00 : f32
    %92 = vector.broadcast %cst_27 : f32 to vector<1x128xf32>
    %93 = arith.addf %91, %92 : vector<1x128xf32>
    %94 = arith.mulf %91, %93 : vector<1x128xf32>
    %95 = arith.addf %91, %93 : vector<1x128xf32>
    %96 = arith.divf %95, %94 : vector<1x128xf32>
    %97 = arith.addf %88, %96 : vector<1x128xf32>
    %98 = arith.mulf %89, %94 : vector<1x128xf32>
    %cst_28 = arith.constant 2.000000e+00 : f32
    %99 = vector.broadcast %cst_28 : f32 to vector<1x128xf32>
    %100 = arith.addf %91, %99 : vector<1x128xf32>
    %cst_29 = arith.constant 1.000000e+00 : f32
    %101 = vector.broadcast %cst_29 : f32 to vector<1x128xf32>
    %102 = arith.divf %101, %100 : vector<1x128xf32>
    %103 = arith.mulf %102, %102 : vector<1x128xf32>
    %104 = math.log %100 : vector<1x128xf32>
    %cst_30 = arith.constant 5.000000e-01 : f32
    %105 = vector.broadcast %cst_30 : f32 to vector<1x128xf32>
    %106 = arith.mulf %105, %102 : vector<1x128xf32>
    %107 = arith.subf %104, %106 : vector<1x128xf32>
    %cst_31 = arith.constant 0.0039682542 : f32
    %108 = vector.broadcast %cst_31 : f32 to vector<1x128xf32>
    %109 = arith.mulf %103, %108 : vector<1x128xf32>
    %cst_32 = arith.constant 0.00833333377 : f32
    %110 = vector.broadcast %cst_32 : f32 to vector<1x128xf32>
    %111 = arith.subf %110, %109 : vector<1x128xf32>
    %112 = arith.mulf %103, %111 : vector<1x128xf32>
    %cst_33 = arith.constant 0.0833333358 : f32
    %113 = vector.broadcast %cst_33 : f32 to vector<1x128xf32>
    %114 = arith.subf %113, %112 : vector<1x128xf32>
    %115 = arith.mulf %103, %114 : vector<1x128xf32>
    %116 = arith.subf %107, %115 : vector<1x128xf32>
    %117 = arith.subf %116, %97 : vector<1x128xf32>
    %cst_34 = arith.constant 5.000000e-01 : f32
    %118 = vector.broadcast %cst_34 : f32 to vector<1x128xf32>
    %119 = arith.subf %100, %118 : vector<1x128xf32>
    %120 = arith.mulf %119, %104 : vector<1x128xf32>
    %121 = arith.subf %120, %100 : vector<1x128xf32>
    %cst_35 = arith.constant 0.918938517 : f32
    %122 = vector.broadcast %cst_35 : f32 to vector<1x128xf32>
    %123 = arith.addf %121, %122 : vector<1x128xf32>
    %cst_36 = arith.constant 7.93650805E-4 : f32
    %124 = vector.broadcast %cst_36 : f32 to vector<1x128xf32>
    %125 = arith.mulf %103, %124 : vector<1x128xf32>
    %cst_37 = arith.constant 0.00277777785 : f32
    %126 = vector.broadcast %cst_37 : f32 to vector<1x128xf32>
    %127 = arith.subf %126, %125 : vector<1x128xf32>
    %128 = arith.mulf %103, %127 : vector<1x128xf32>
    %cst_38 = arith.constant 0.0833333358 : f32
    %129 = vector.broadcast %cst_38 : f32 to vector<1x128xf32>
    %130 = arith.subf %129, %128 : vector<1x128xf32>
    %131 = arith.mulf %102, %130 : vector<1x128xf32>
    %132 = arith.addf %123, %131 : vector<1x128xf32>
    %133 = math.log %98 : vector<1x128xf32>
    %134 = arith.subf %132, %133 : vector<1x128xf32>
    %cst_39 = arith.constant 0.000000e+00 : f32
    %135 = vector.broadcast %cst_39 : f32 to vector<16x128xf32>
    %136 = arith.subf %135, %6 : vector<16x128xf32>
    %137 = arith.mulf %136, %54 : vector<16x128xf32>
    %cst_40 = arith.constant 1.000000e+00 : f32
    %138 = vector.broadcast %cst_40 : f32 to vector<16x128xf32>
    %139 = arith.subf %0, %138 : vector<16x128xf32>
    %140 = arith.mulf %139, %54 : vector<16x128xf32>
    %141 = arith.subf %71, %140 : vector<16x128xf32>
    %cst_41 = arith.constant 5.000000e-02 : f32
    %142 = vector.broadcast %cst_41 : f32 to vector<16x128xf32>
    %143 = arith.mulf %142, %141 : vector<16x128xf32>
    %144 = arith.subf %137, %143 : vector<16x128xf32>
    %cst_42 = arith.constant dense<0.000000e+00> : vector<128xf32>
    %145 = vector.multi_reduction <add>, %144, %cst_42 [0] : vector<16x128xf32> to vector<128xf32>
    %146 = vector.shape_cast %145 : vector<128xf32> to vector<1x128xf32>
    %147 = arith.addf %146, %117 : vector<1x128xf32>
    %cst_43 = arith.constant 5.000000e-02 : f32
    %148 = vector.broadcast %cst_43 : f32 to vector<1x128xf32>
    %149 = arith.mulf %148, %134 : vector<1x128xf32>
    %150 = arith.addf %147, %149 : vector<1x128xf32>
    %cst_44 = arith.constant 1.600000e+01 : f32
    %151 = vector.broadcast %cst_44 : f32 to vector<1x128xf32>
    %152 = arith.subf %8, %151 : vector<1x128xf32>
    %cst_45 = arith.constant 5.000000e-02 : f32
    %153 = vector.broadcast %cst_45 : f32 to vector<1x128xf32>
    %154 = arith.mulf %153, %152 : vector<1x128xf32>
    %155 = arith.mulf %154, %117 : vector<1x128xf32>
    %156 = arith.subf %150, %155 : vector<1x128xf32>
    %c128_i32 = arith.constant 128 : i32
    %157 = arith.muli %arg0, %c128_i32 : i32
    %158 = tpu.iota {dimensions = array<i32: 1>} : vector<1x128xi32>
    %159 = vector.broadcast %157 : i32 to vector<1x128xi32>
    %160 = arith.addi %159, %158 : vector<1x128xi32>
    %c8_i32 = arith.constant 8 : i32
    %161 = vector.broadcast %c8_i32 : i32 to vector<1x128xi32>
    %162 = arith.cmpi slt, %160, %161 : vector<1x128xi32>
    %cst_46 = arith.constant 0.000000e+00 : f32
    %163 = vector.broadcast %cst_46 : f32 to vector<1x128xf32>
    %164 = arith.select %162, %156, %163 : vector<1x128xi1>, vector<1x128xf32>
    %c0_47 = arith.constant 0 : index
    %c0_48 = arith.constant 0 : index
    %165 = vector.load %arg3[%c0_47, %c0_48] : memref<1x128xf32, #tpu.memory_space<vmem>>, vector<1x128xf32>
    tpu.vector_store %arg3[%c0_47, %c0_48], %164 {strides = array<i32>} : memref<1x128xf32, #tpu.memory_space<vmem>>, vector<1x128xf32>,
    return
  }
  func.func @transform_0(%arg0: i32) -> (i32, i32) {
    %c0_i32 = arith.constant 0 : i32
    %c0_i32_0 = arith.constant 0 : i32
    return %c0_i32, %arg0 : i32, i32
  }
  func.func @transform_1(%arg0: i32) -> (i32, i32) {
    %c0_i32 = arith.constant 0 : i32
    %c0_i32_0 = arith.constant 0 : i32
    return %c0_i32, %arg0 : i32, i32
  }
  func.func @transform_2(%arg0: i32) -> (i32, i32) {
    %c0_i32 = arith.constant 0 : i32
    %c0_i32_0 = arith.constant 0 : i32
    return %c0_i32, %arg0 : i32, i32
  }
}

</mosaic_0001>

<bundles_post_ra>
// kernel: tpu_custom_call.1
= control target key start
LH: loop header
LB: loop body
LE: loop exit
PB: predicated region body
PF: predicated region fallthrough
CT: control target
= control target key end

     0   :  { %7 = vsyncpa [#allocation3], 0  ;;  %s477_s0 = inlined_call_operand.hbm [shape: f32[16,128], index: 0, kind: input, shape index: {}]   ;;  %s478_s1 = inlined_call_operand.vmem [shape: s32[1,128], index: 1, kind: input, shape index: {}]   ;;  %s479_s2 = inlined_call_operand.hbm [shape: f32[1,128], index: 2, kind: output, shape index: {}]  }
   0x1   :  { %8 = vsyncpa [#allocation4], 0  ;;  %s348_s9 = smov [#allocation2]   ;;  %s300_s13 = scalar_lea.hbm %s477_s0, 256 }
   0x2   :  { %s14_s10 = sshll.u32 %s348_s9, 4  ;;  %p301_p0 = scmp.ne.s32.totalorder %s477_s0, %s300_s13  ;;  %s15_s10 = int_to_ptr.vmem [resolvable:$true] %s14_s10 }
   0x3   :  { %p304_p1 = scmp.lt.u32.totalorder %s300_s13, %s477_s0 }
   0x5   :  { %p306_p2 = pnand %p304_p1, %p301_p0 }
   0x7   :  { %309 = shalt.err (!%p306_p2)
}
   0x8   :  { %s310_s18 = scalar_lea.vmem %s15_s10, 256  ;;  %p315_p4 = scmp.lt.s32.totalorder %s15_s10, %s15_s10 }
   0x9   :  { %p311_p3 = scmp.ne.s32.totalorder %s15_s10, %s310_s18  ;;  %p316_p5 = scmp.lt.s32.totalorder %s310_s18, %s310_s18 }
   0xb   :  { %p317_p6 = por %p316_p5, %p315_p4 }
   0xd   :  { %p318_p7 = pnand %p317_p6, %p311_p3 }
   0xf   :  { %321 = shalt.err (!%p318_p7)
}
  0x10   :  { %s349_s19 = smov 128   ;;  %s350_s20 = smov 8  }
  0x11   :  { %20 = dma.hbm_to_vmem [thread:$0]  %s477_s0, 256, %s15_s10, [#allocation3], %s349_s19, %s349_s19, %s350_s20  }
  0x12   :  { %344 = dma.done.wait [#allocation3], 256  }
  0x13   :  { %345 = vsyncadd [#allocation3], 4294967040  ;;  %v380_v0 = vld [vmem:[#allocation2] sm:$0xff]  ;;  %v382_v1 = vld [vmem:[#allocation2 + $0x8] sm:$0xff]  ;;  %v29_v23 = vlaneseq  ;;  %v351_v56 = vmov 0.0  }
  0x14   :  { %v42_v2 = vadd.f32 %v382_v1, %v380_v0  ;;  %v49_v3 = vadd.f32 1.0, %v380_v0  ;;  %v50_v4 = vadd.f32 1.0, %v382_v1  ;;  %v61_v5 = vadd.f32 2.0, %v380_v0  ;;  %v406_v32 = vld [vmem:[%s478_s1] ss:$0 sm:$0xff]  ;;  %s352_s1 = smov [#allocation5]  }
  0x15   :  { %v62_v8 = vadd.f32 2.0, %v382_v1  ;;  %v30_v30 = vshrl.u32 %v29_v23, 7  ;;  %s241_s24 = sshll.u32 %s352_s1, 4  ;;  %s242_s24 = int_to_ptr.vmem [resolvable:$true] %s241_s24 }
  0x16   :  { %v43_v6 = vrot.slane %v42_v2, 4  ;;  %v51_v7 = vmul.f32 %v49_v3, %v380_v0  ;;  %v52_v9 = vmul.f32 %v50_v4, %v382_v1  ;;  %v63_v10 = vadd.f32 1.0, %v61_v5  ;;  %s322_s25 = scalar_lea.vmem %s242_s24, 16  ;;  %s326_s26 = scalar_lea.vmem %s242_s24, 32 }
  0x17   :  { %v77_v11 = vadd.f32 2.0, %v61_v5  ;;  %v64_v13 = vadd.f32 1.0, %v62_v8  ;;  %v78_v14 = vadd.f32 2.0, %v62_v8  ;;  %v53_v31 = vadd.f32 %v49_v3, %v380_v0  ;;  %p323_p8 = scmp.ne.s32.totalorder %s242_s24, %s322_s25  ;;  %p327_p9 = scmp.lt.s32.totalorder %s242_s24, %s242_s24 }
  0x18   :  { %v44_v12 = vadd.f32 %v43_v6, %v42_v2  ;;  %264 = vrcp.f32 %v51_v7  ;;  %v65_v15 = vmul.f32 %v63_v10, %v61_v5  ;;  %v67_v33 = vadd.f32 %v63_v10, %v61_v5  ;;  %p328_p10 = scmp.lt.s32.totalorder %s326_s26, %s322_s25 }
  0x19   :  { %v79_v16 = vadd.f32 1.0, %v77_v11  ;;  %266 = vrcp.f32 %v52_v9  ;;  %v66_v18 = vmul.f32 %v64_v13, %v62_v8  ;;  %v80_v19 = vadd.f32 1.0, %v78_v14 }
  0x1a   :  { %v45_v17 = vrot.slane %v44_v12, 2  ;;  %268 = vrcp.f32 %v65_v15  ;;  %v392_v24 = vadd.f32 2.0, %v77_v11  ;;  %v394_v26 = vadd.f32 2.0, %v78_v14  ;;  %p329_p11 = por %p328_p10, %p327_p9 }
  0x1b   :  { %v81_v20 = vmul.f32 %v79_v16, %v77_v11  ;;  %270 = vrcp.f32 %v66_v18  ;;  %v82_v22 = vmul.f32 %v80_v19, %v78_v14  ;;  %v75_v27 = vmul.f32 %v65_v15, %v51_v7 }
  0x1c   :  { %v46_v21 = vadd.f32 %v45_v17, %v44_v12  ;;  %v76_v29 = vmul.f32 %v66_v18, %v52_v9  ;;  %v54_v37 = vadd.f32 %v50_v4, %v382_v1  ;;  %v68_v38 = vadd.f32 %v64_v13, %v62_v8  ;;  %p330_p12 = pnand %p329_p11, %p323_p8 }
  0x1d   :  { %272 = vrcp.f32 %v81_v20  ;;  %v91_v39 = vmul.f32 %v81_v20, %v75_v27  ;;  %v416_v43 = vadd.s32 8, %v30_v30  ;;  %vm36_vm0 = vcmp.eq.s32.totalorder %v30_v30, %v406_v32 }
  0x1e   :  { %v47_v25 = vrot.slane %v46_v21, 1  ;;  %274 = vrcp.f32 %v82_v22  ;;  %v92_v41 = vmul.f32 %v82_v22, %v76_v29  ;;  %v83_v49 = vadd.f32 %v79_v16, %v77_v11 }
  0x1f   :  { %276 = vrcp.f32 %v392_v24  ;;  %v84_v54 = vadd.f32 %v80_v19, %v78_v14  ;;  %v428_v57 = vsel %vm36_vm0, 1.0, %v351_v56  ;;  %v253_v60 = vadd.f32 -0.5, %v392_v24 }
  0x20   :  { %v397_v28 = vadd.f32 %v47_v25, %v46_v21  ;;  %278 = vrcp.f32 %v394_v26  ;;  %v254_v61 = vadd.f32 -0.5, %v394_v26  ;;  %vm37_vm1 = vcmp.eq.s32.totalorder %v416_v43, %v406_v32 }
  0x21   :  { %280 = vlog2.f32 %v392_v24 }
  0x22   :  { %282 = vlog2.f32 %v394_v26  ;;  %v410_v34 = vadd.f32 1.0, %v397_v28  ;;  %v413_v35 = vadd.f32 2.0, %v397_v28  ;;  %v265_v36 = vpop.eup %264 }
  0x23   :  { %v267_v40 = vpop.eup %266  ;;  %v56_v47 = vmul.f32 %v265_v36, %v53_v31  ;;  %284 = vlog2.f32 %v91_v39 }
  0x24   :  { %v269_v42 = vpop.eup %268  ;;  %v150_v44 = vmul.f32 %v410_v34, %v397_v28  ;;  %v422_v45 = vadd.f32 1.0, %v413_v35  ;;  %v425_v50 = vadd.f32 2.0, %v413_v35  ;;  %v58_v52 = vmul.f32 %v267_v40, %v54_v37 }
  0x25   :  { %v271_v46 = vpop.eup %270  ;;  %v70_v48 = vmul.f32 %v269_v42, %v67_v33  ;;  %286 = vlog2.f32 %v92_v41  ;;  %v151_v43 = vadd.f32 %v410_v34, %v397_v28 }
  0x26   :  { %v72_v53 = vmul.f32 %v271_v46, %v68_v38  ;;  %v157_v58 = vmul.f32 %v422_v45, %v413_v35  ;;  %288 = vrcp.f32 %v150_v44  ;;  %v435_v62 = vadd.f32 1.0, %v425_v50 }
  0x27   :  { %v273_v51 = vpop.eup %272  ;;  %v73_v2 = vadd.f32 %v70_v48, %v56_v47  ;;  %v438_v5 = vadd.f32 2.0, %v425_v50 }
  0x28   :  { %v275_v55 = vpop.eup %274  ;;  %v86_v3 = vmul.f32 %v273_v51, %v83_v49  ;;  %v74_v7 = vadd.f32 %v72_v53, %v58_v52  ;;  %290 = vrcp.f32 %v157_v58  ;;  %v162_v18 = vmul.f32 %v157_v58, %v150_v44 }
  0x29   :  { %v277_v59 = vpop.eup %276  ;;  %v88_v8 = vmul.f32 %v275_v55, %v84_v54  ;;  %v165_v37 = vmul.f32 %v435_v62, %v425_v50  ;;  %292 = vrcp.f32 %v438_v5 }
  0x2a   :  { %v279_v63 = vpop.eup %278  ;;  %v99_v4 = vmul.f32 %v277_v59, %v277_v59  ;;  %v105_v10 = vmul.f32 0.5, %v277_v59  ;;  %v89_v25 = vadd.f32 %v86_v3, %v73_v2  ;;  %294 = vlog2.f32 %v438_v5 }
  0x2b   :  { %v281_v6 = vpop.eup %280  ;;  %v100_v9 = vmul.f32 %v279_v63, %v279_v63  ;;  %v106_v19 = vmul.f32 0.5, %v279_v63  ;;  %296 = vrcp.f32 %v165_v37 }
  0x2c   :  { %v283_v11 = vpop.eup %282  ;;  %v102_v12 = vmul.f32 0.6931472, %v281_v6  ;;  %v109_v13 = vmul.f32 0.003968254, %v99_v4  ;;  %v131_v14 = vmul.f32 0.0007936508, %v99_v4 }
  0x2d   :  { %v104_v15 = vmul.f32 0.6931472, %v283_v11  ;;  %v110_v16 = vmul.f32 0.003968254, %v100_v9  ;;  %v132_v17 = vmul.f32 0.0007936508, %v100_v9  ;;  %v285_v38 = vpop.eup %284 }
  0x2e   :  { %v111_v20 = vsub.f32 0.008333334, %v109_v13  ;;  %v125_v21 = vmul.f32 %v253_v60, %v102_v12  ;;  %v133_v22 = vsub.f32 0.0027777778, %v131_v14  ;;  %v107_v39 = vsub.f32 %v102_v12, %v105_v10 }
  0x2f   :  { %v112_v27 = vsub.f32 0.008333334, %v110_v16  ;;  %v126_v29 = vmul.f32 %v254_v61, %v104_v15  ;;  %v134_v30 = vsub.f32 0.0027777778, %v132_v17  ;;  %v287_v44 = vpop.eup %286  ;;  %v108_v46 = vsub.f32 %v104_v15, %v106_v19 }
  0x30   :  { %v113_v31 = vmul.f32 %v111_v20, %v99_v4  ;;  %v127_v33 = vsub.f32 %v125_v21, %v392_v24  ;;  %v135_v36 = vmul.f32 %v133_v22, %v99_v4  ;;  %v289_v51 = vpop.eup %288  ;;  %v144_v58 = vmul.f32 0.6931472, %v285_v38 }
  0x31   :  { %v114_v40 = vmul.f32 %v112_v27, %v100_v9  ;;  %v128_v41 = vsub.f32 %v126_v29, %v394_v26  ;;  %v136_v42 = vmul.f32 %v134_v30, %v100_v9  ;;  %v90_v60 = vadd.f32 %v88_v8, %v74_v7 }
  0x32   :  { %v115_v47 = vsub.f32 0.083333336, %v113_v31  ;;  %v129_v48 = vadd.f32 0.9189385, %v127_v33  ;;  %v137_v49 = vsub.f32 0.083333336, %v135_v36  ;;  %v291_v3 = vpop.eup %290  ;;  %v166_v30 = vadd.f32 %v435_v62, %v425_v50 }
  0x33   :  { %v116_v52 = vsub.f32 0.083333336, %v114_v40  ;;  %v130_v53 = vadd.f32 0.9189385, %v128_v41  ;;  %v138_v54 = vsub.f32 0.083333336, %v136_v42  ;;  %v293_v19 = vpop.eup %292  ;;  %v153_v36 = vmul.f32 %v289_v51, %v151_v43 }
  0x34   :  { %v117_v24 = vmul.f32 %v115_v47, %v99_v4  ;;  %v139_v55 = vmul.f32 %v277_v59, %v137_v49  ;;  %v146_v2 = vmul.f32 0.6931472, %v287_v44  ;;  %v252_v6 = vsel %vm37_vm1, 1.0, %v351_v56 }
  0x35   :  { %v118_v61 = vmul.f32 %v116_v52, %v100_v9  ;;  %v140_v26 = vmul.f32 %v279_v63, %v138_v54  ;;  %v256_v12 = vadd.f32 -1.0, %v380_v0  ;;  %v170_v59 = vmul.f32 %v165_v37, %v162_v18 }
  0x36   :  { %v119_v10 = vsub.f32 %v107_v39, %v117_v24  ;;  %v141_v11 = vadd.f32 %v139_v55, %v129_v48  ;;  %v257_v14 = vadd.f32 -1.0, %v382_v1  ;;  %v199_v63 = vsub.f32 0.0, %v428_v57  ;;  %v295_v57 = vpop.eup %294 }
  0x37   :  { %v120_v13 = vsub.f32 %v108_v46, %v118_v61  ;;  %v142_v4 = vadd.f32 %v140_v26, %v130_v53  ;;  %v200_v16 = vsub.f32 0.0, %v252_v6  ;;  %298 = vlog2.f32 %v170_v59 }
  0x38   :  { %v121_v15 = vsub.f32 %v119_v10, %v89_v25  ;;  %v147_v7 = vsub.f32 %v141_v11, %v144_v58  ;;  %v158_v1 = vadd.f32 %v422_v45, %v413_v35  ;;  %v255_v18 = vadd.f32 -0.5, %v438_v5  ;;  %v297_v35 = vpop.eup %296 }
  0x39   :  { %v122_v8 = vsub.f32 %v120_v13, %v90_v60  ;;  %v148_v9 = vsub.f32 %v142_v4, %v146_v2  ;;  %v174_v22 = vmul.f32 %v293_v19, %v293_v19  ;;  %v176_v27 = vmul.f32 0.6931472, %v295_v57 }
  0x3a   :  { %v205_v17 = vmul.f32 %v256_v12, %v121_v15  ;;  %v201_v0 = vmul.f32 %v199_v63, %v121_v15  ;;  %v160_v37 = vmul.f32 %v291_v3, %v158_v1  ;;  %v177_v45 = vmul.f32 0.5, %v293_v19 }
  0x3b   :  { %v206_v32 = vmul.f32 %v257_v14, %v122_v8  ;;  %v202_v20 = vmul.f32 %v200_v16, %v122_v8  ;;  %v179_v31 = vmul.f32 0.003968254, %v174_v22  ;;  %v190_v34 = vmul.f32 0.0007936508, %v174_v22 }
  0x3c   :  { %v207_v56 = vsub.f32 %v147_v7, %v205_v17  ;;  %v187_v38 = vmul.f32 %v255_v18, %v176_v27  ;;  %v161_v49 = vadd.f32 %v160_v37, %v153_v36  ;;  %v168_v52 = vmul.f32 %v297_v35, %v166_v30 }
  0x3d   :  { %v208_v21 = vsub.f32 %v148_v9, %v206_v32  ;;  %v180_v40 = vsub.f32 0.008333334, %v179_v31  ;;  %v191_v41 = vsub.f32 0.0027777778, %v190_v34  ;;  %v178_v62 = vsub.f32 %v176_v27, %v177_v45 }
  0x3e   :  { %v209_v25 = vmul.f32 0.05, %v207_v56  ;;  %v188_v42 = vsub.f32 %v187_v38, %v438_v5  ;;  %v169_v61 = vadd.f32 %v168_v52, %v161_v49  ;;  %v258_v2 = vadd.f32 -16.0, %v397_v28 }
  0x3f   :  { %v210_v29 = vmul.f32 0.05, %v208_v21  ;;  %v181_v46 = vmul.f32 %v180_v40, %v174_v22  ;;  %v192_v47 = vmul.f32 %v191_v41, %v174_v22  ;;  %v229_v14 = vand.u32 127, %v29_v23 }
  0x40   :  { %v211_v33 = vsub.f32 %v201_v0, %v209_v25  ;;  %v189_v54 = vadd.f32 0.9189385, %v188_v42  ;;  %v224_v13 = vmul.f32 0.05, %v258_v2 }
  0x41   :  { %v212_v39 = vsub.f32 %v202_v20, %v210_v29  ;;  %v299_v48 = vpop.eup %298  ;;  %v182_v53 = vsub.f32 0.083333336, %v181_v46  ;;  %v193_v51 = vsub.f32 0.083333336, %v192_v47  ;;  %vm232_vm2 = vcmp.lt.s32.totalorder %v229_v14, 8 }
  0x42   :  { %v197_v60 = vmul.f32 0.6931472, %v299_v48 }
  0x43   :  { %v213_v44 = vadd.f32 %v212_v39, %v211_v33  ;;  %v183_v55 = vmul.f32 %v182_v53, %v174_v22  ;;  %v194_v58 = vmul.f32 %v293_v19, %v193_v51 }
  0x45   :  { %v214_v50 = vrot.slane %v213_v44, 4  ;;  %v184_v5 = vsub.f32 %v178_v62, %v183_v55  ;;  %v195_v3 = vadd.f32 %v194_v58, %v189_v54 }
  0x47   :  { %v215_v24 = vadd.f32 %v214_v50, %v213_v44  ;;  %v198_v10 = vsub.f32 %v195_v3, %v197_v60  ;;  %v185_v11 = vsub.f32 %v184_v5, %v169_v61 }
  0x49   :  { %v216_v26 = vrot.slane %v215_v24, 2  ;;  %v221_v59 = vmul.f32 0.05, %v198_v10  ;;  %v225_v7 = vmul.f32 %v224_v13, %v185_v11 }
  0x4b   :  { %v217_v6 = vadd.f32 %v216_v26, %v215_v24 }
  0x4d   :  { %v218_v12 = vrot.slane %v217_v6, 1 }
  0x4f   :  { %v219_v4 = vadd.f32 %v218_v12, %v217_v6 }
  0x51   :  { %v220_v15 = vadd.f32 %v219_v4, %v185_v11 }
  0x53   :  { %v222_v63 = vadd.f32 %v221_v59, %v220_v15 }
  0x55   :  { %v226_v8 = vsub.f32 %v222_v63, %v225_v7 }
  0x57   :  { %v233_v28 = vsel %vm232_vm2, %v226_v8, 0.0 }
  0x58   :  { %234 = vst [vmem:[#allocation5] sm:$0x1] %v233_v28 }
  0x59   :  { %333 = shalt.err (!%p330_p12)
}
  0x5a   :  { %s334_s29 = scalar_lea.hbm %s479_s2, 16 }
  0x5b   :  { %p335_p13 = scmp.ne.s32.totalorder %s479_s2, %s334_s29  ;;  %p338_p0 = scmp.lt.u32.totalorder %s334_s29, %s479_s2 }
  0x5d   :  { %p340_p1 = pnand %p338_p0, %p335_p13 }
  0x5f   :  { %343 = shalt.err (!%p340_p1)
}
  0x60   :  { %244 = dma.vmem_to_hbm [thread:$0]  %s242_s24, 16, %s479_s2, [#allocation4]  }
  0x61   :  { %346 = dma.done.wait [#allocation4], 16  }
  0x62   :  { %347 = vsyncadd [#allocation4], 4294967280 }
  0x63   :  { %248 = vsyncpa [#allocation3], 1 }
  0x64   :  { %249 = vsyncpa [#allocation4], 1 }

</bundles_post_ra>
